<compile_context>
chip_gen: v7x
topology: tpu7x:2x2x1
jax: 0.10.0
libtpu: 0.0.40
codegen_flags: <defaults>
</compile_context>

<pallas_src>
import numpy as np
import jax
import jax.numpy as jnp
from jax.experimental import pallas as pl
from jax.experimental.pallas import tpu as pltpu

VMEM_SPEC = pl.BlockSpec(memory_space=pltpu.MemorySpace.VMEM)

LANE = 128          # lane width / hidden dim
TM = 256            # row tile for the gridded kernels
KB_CAND_PAD = 64    # fixed candidate batch (matches reference's 64-chunking)
KB_SEQ_PAD = 16     # fixed KB-sequence bucket -> single compile across batches


# ----------------------------- Pallas kernels ------------------------------
def _ner_fused_kernel(x_ref, w_ref, b_ref, sw_ref, sb_ref, o_ref):
    """Features (L x Linear+ReLU) fused with the Locate_Entity score head.

    x : (TM, H)    f32 BERT token features (row tile)
    w : (L, H, H)  bf16 stacked NER weights
    b : (L, 1, H)  f32  stacked NER biases
    sw: (H, 128)   bf16 score-head weights padded to lane width (cols 0,1 real)
    sb: (1, 128)   f32  score-head bias padded to lane width
    o : (TM, 128)  f32  [B-logit, E-logit, 0...] per row (lane-dense store)
    """
    h = x_ref[...]
    for l in range(w_ref.shape[0]):                       # static -> unrolled
        h = jnp.maximum(
            jnp.dot(h.astype(jnp.bfloat16), w_ref[l],
                    preferred_element_type=jnp.float32) + b_ref[l], 0.0)
    o_ref[...] = (jnp.dot(h.astype(jnp.bfloat16), sw_ref[...],
                          preferred_element_type=jnp.float32) + sb_ref[...])


def _link_proj_kernel(e_ref, w_ref, b_ref, o_ref):
    """Features_Link projection: tanh(emb @ W + b).

    e : (TM, 128) bf16 embedding rows (E=64 zero-padded to 128 lanes)
    w : (128, H)  bf16 (pad rows zero)
    b : (1, H)    f32
    o : (TM, H)   f32
    """
    o_ref[...] = jnp.tanh(
        jnp.dot(e_ref[...], w_ref[...], preferred_element_type=jnp.float32)
        + b_ref[...])


def _link_kb_kernel(t_ref, k_ref, kmask_ref, klen_ref, w_ref, b_ref, o_ref):
    """Link_KB bilinear score, algebraically restructured.

    t    : (1, St, H)  f32 text features (shared by all candidates, passed once)
    k    : (N, Sk, H)  f32 KB candidate features
    kmask: (N, Sk, 1)  f32 1.0 for real tokens, 0.0 for pads
    klen : (N, 1)      f32 true candidate lengths (>=1)
    w    : (H, H)      bf16 bilinear weight
    b    : (1, 1)      f32
    o    : (N, 128)    f32 logit broadcast across lanes (lane-dense store)
    """
    t_pool = jnp.mean(t_ref[...], axis=1)                                 # (1, H)
    v = jnp.dot(t_pool.astype(jnp.bfloat16), w_ref[...],
                preferred_element_type=jnp.float32)                       # (1, H)
    k_pool = jnp.sum(k_ref[...] * kmask_ref[...], axis=1) / klen_ref[...] # (N, H)
    logit = jnp.sum(k_pool * v, axis=-1, keepdims=True) + b_ref[...]      # (N, 1)
    o_ref[...] = jnp.broadcast_to(logit, o_ref.shape)


# ------------------------------ helpers (glue) ------------------------------
def _pad_rows(x, multiple):
    m = x.shape[0]
    mp = ((m + multiple - 1) // multiple) * multiple
    if mp == m:
        return x, m
    return jnp.pad(x, ((0, mp - m), (0, 0))), m


def seqs2batch_fixed(seqs, n_pad, s_min):
    """Pad int sequences to a fixed (n_pad, s_pad) int32 batch + true lengths."""
    assert len(seqs) <= n_pad
    max_len = max(len(s) for s in seqs)
    s_pad = max(s_min, ((max_len + 7) // 8) * 8)   # usually == s_min -> fixed shape
    out = np.zeros((n_pad, s_pad), dtype=np.int32)
    lens = np.zeros((n_pad,), dtype=np.int32)
    for i, s in enumerate(seqs):
        out[i, :len(s)] = np.asarray(s, dtype=np.int32)
        lens[i] = len(s)
    return out, lens


# --------------------------------- model -----------------------------------
class NetPallas:
    def __init__(self, vocab_size, embedding_dim=64, num_layers=3,
                 hidden_dim=128, key=None):
        assert hidden_dim % LANE == 0
        self.hidden_dim = hidden_dim
        self.embedding_dim = embedding_dim
        self.num_layers = num_layers
        H, E, L = hidden_dim, embedding_dim, num_layers
        Ep = ((E + LANE - 1) // LANE) * LANE
        self._emb_pad_dim = Ep

        ks = jax.random.split(key, 6)
        f32, bf16 = jnp.float32, jnp.bfloat16
        score_w = 0.05 * jax.random.normal(ks[1], (H, 2), f32)
        emb = 0.1 * jax.random.normal(ks[2], (vocab_size, E), f32)
        link_w = 0.05 * jax.random.normal(ks[3], (E, H), f32)

        self.params = {
            # Features (NER): num_layers x Linear(H, H) -- bf16 MXU operands
            "ner_w": (0.05 * jax.random.normal(ks[0], (L, H, H), f32)).astype(bf16),
            "ner_b": jnp.zeros((L, 1, H), f32),
            # Locate_Entity head, padded to 128 lanes (cols 0/1 = B/E logits)
            "score_w": jnp.zeros((H, LANE), f32).at[:, :2].set(score_w).astype(bf16),
            "score_b": jnp.zeros((1, LANE), f32),
            # Features_Link: Embedding(V, E) + Linear(E, H), E padded to 128 lanes
            "emb": jnp.zeros((vocab_size, Ep), f32).at[:, :E].set(emb).astype(bf16),
            "link_w": jnp.zeros((Ep, H), f32).at[:E, :].set(link_w).astype(bf16),
            "link_b": jnp.zeros((1, H), f32),
            # Link_KB: bilinear W (H, H) + scalar bias
            "kb_w": (0.05 * jax.random.normal(ks[4], (H, H), f32)).astype(bf16),
            "kb_b": jnp.zeros((1, 1), f32),
        }

    # ---- fused Features (NER) + Locate_Entity ----
    def get_entity_scores(self, text_bert_features):
        B, S, H = text_bert_features.shape
        L = self.num_layers
        x = text_bert_features.reshape(B * S, H).astype(jnp.float32)
        x, m = _pad_rows(x, TM)
        mp = x.shape[0]
        out = pl.pallas_call(
            _ner_fused_kernel,
            out_shape=jax.ShapeDtypeStruct((mp, LANE), jnp.float32),
            grid=(mp // TM,),
            in_specs=[
                pl.BlockSpec((TM, H), lambda i: (i, 0)),
                pl.BlockSpec((L, H, H), lambda i: (0, 0, 0)),
                pl.BlockSpec((L, 1, H), lambda i: (0, 0, 0)),
                pl.BlockSpec((H, LANE), lambda i: (0, 0)),
                pl.BlockSpec((1, LANE), lambda i: (0, 0)),
            ],
            out_specs=pl.BlockSpec((TM, LANE), lambda i: (i, 0)),
            compiler_params=pltpu.CompilerParams(
                dimension_semantics=("parallel",)),
        )(x, self.params["ner_w"], self.params["ner_b"],
          self.params["score_w"], self.params["score_b"])
        scores = out[:m, :2].reshape(B, S, 2)
        return scores[..., 0], scores[..., 1]            # (B, S), (B, S)

    # ---- Features_Link ----
    def get_features_link(self, seqs):
        seqs = jnp.asarray(seqs, jnp.int32)
        B, S = seqs.shape
        H, Ep = self.hidden_dim, self._emb_pad_dim
        emb = jnp.take(self.params["emb"], seqs, axis=0)       # (B, S, Ep) glue
        x = emb.reshape(B * S, Ep)
        x, m = _pad_rows(x, TM)
        mp = x.shape[0]
        out = pl.pallas_call(
            _link_proj_kernel,
            out_shape=jax.ShapeDtypeStruct((mp, H), jnp.float32),
            grid=(mp // TM,),
            in_specs=[
                pl.BlockSpec((TM, Ep), lambda i: (i, 0)),
                pl.BlockSpec((Ep, H), lambda i: (0, 0)),
                pl.BlockSpec((1, H), lambda i: (0, 0)),
            ],
            out_specs=pl.BlockSpec((TM, H), lambda i: (i, 0)),
            compiler_params=pltpu.CompilerParams(
                dimension_semantics=("parallel",)),
        )(x, self.params["link_w"], self.params["link_b"])
        return out[:m].reshape(B, S, H)

    # ---- Link_KB ----
    def link_kb(self, text_features, kb_features, kb_mask, kb_len):
        # text_features: (1, St, H) shared; kb_features: (N, Sk, H)
        N = kb_features.shape[0]
        logits = pl.pallas_call(
            _link_kb_kernel,
            out_shape=jax.ShapeDtypeStruct((N, LANE), jnp.float32),
            in_specs=[VMEM_SPEC] * 6,
            out_specs=VMEM_SPEC,
        )(text_features.astype(jnp.float32),
          kb_features.astype(jnp.float32),
          kb_mask.astype(jnp.float32)[:, :, None],
          jnp.maximum(kb_len.astype(jnp.float32), 1.0)[:, None],
          self.params["kb_w"], self.params["kb_b"])
        return logits[:, 0]                                     # (N,)

    # ---- forward (mirrors PyTorch Net.forward) ----
    def forward(self, text_seq, text, alias_data, entity_predict=None,
                text_bert_features=None, mask_loss=None):
        if entity_predict is None:
            # TODO(synk): text2bert (external pretrained BERT encoder) has no
            # Pallas equivalent; token features are supplied by the caller.
            entity_predict = []
            entity_B_scores, entity_E_scores = self.get_entity_scores(text_bert_features)
            entity_B_scores = entity_B_scores[:, 1:]           # drop [CLS]
            entity_E_scores = entity_E_scores[:, 1:]
            entity_B_scores = np.asarray(jax.nn.sigmoid(entity_B_scores[0])).tolist()
            entity_E_scores = np.asarray(jax.nn.sigmoid(entity_E_scores[0])).tolist()
            for entity_B_idx, entity_B_score in enumerate(entity_B_scores):
                if entity_B_score > 0.5:
                    for entity_E_idx, entity_E_score in enumerate(entity_E_scores[entity_B_idx:]):
                        if entity_E_score > 0.5:
                            entity_idx = [entity_B_idx, entity_B_idx + entity_E_idx]
                            entity = text[entity_idx[0]:entity_idx[1] + 1]
                            if entity in alias_data:
                                entity_predict.append((entity, entity_idx[0], entity_idx[1]))
                            break

        results = []
        if not entity_predict:
            return results

        # Hoisted out of the per-entity loop: identical for every entity.
        entity_features = self.get_features_link(text_seq)     # (1, St, H)

        for entity_info in entity_predict:
            entity, s, e = entity_info
            if entity not in alias_data:
                continue
            alias_predict = alias_data.get(entity.lower(), alias_data[entity])
            kb_ids = list(alias_predict.keys())
            num_batch = (len(kb_ids) - 1) // KB_CAND_PAD + 1
            link_scores = []
            for n in range(num_batch):
                kb_ids_batch = kb_ids[n * KB_CAND_PAD:n * KB_CAND_PAD + KB_CAND_PAD]
                kb_seqs = [alias_predict[kb_id]["data_seq"] for kb_id in kb_ids_batch]
                kb_seqs_np, kb_lens_np = seqs2batch_fixed(kb_seqs, KB_CAND_PAD, KB_SEQ_PAD)
                kb_features = self.get_features_link(jnp.asarray(kb_seqs_np))   # (64, Sk, H)
                kb_lens = jnp.asarray(kb_lens_np, jnp.int32)
                kb_mask = (jnp.arange(kb_seqs_np.shape[1])[None, :]
                           < kb_lens[:, None]).astype(jnp.float32)
                link_logits = self.link_kb(entity_features, kb_features,
                                           kb_mask, kb_lens)
                link_logits = link_logits[:len(kb_ids_batch)]   # drop pad candidates
                link_scores += np.asarray(jax.nn.sigmoid(link_logits)).tolist()
            score = max(link_scores)
            results.append((kb_ids[link_scores.index(score)], entity, s, e, float(score)))
        return results


# ----------------------------------- main -----------------------------------
if __name__ == "__main__":
    vocab_size, embedding_dim, hidden_dim, num_layers = 100, 64, 128, 3
    net = NetPallas(vocab_size, embedding_dim=embedding_dim,
                    num_layers=num_layers, hidden_dim=hidden_dim,
                    key=jax.random.PRNGKey(0))

    # synthetic character-level text + token ids
    text = "abcdefghijklmnop"                                   # 16 chars
    text_seq = jnp.asarray(
        [[(ord(c) - ord('a')) % vocab_size + 1 for c in text]], jnp.int32)   # (1, 16)

    # synthetic knowledge-base alias table: entity "cde" -> 8 candidate entries
    kb_keys = jax.random.split(jax.random.PRNGKey(1), 8)
    alias_data = {
        "cde": {
            f"kb{i}": {"data_seq": [int(v) for v in
                                    jax.random.randint(kb_keys[i], (6 + i % 4,), 1, vocab_size)]}
            for i in range(8)
        }
    }

    # deterministic stand-in for the BERT token features ([CLS] + 16 tokens)
    bert_feats = jax.random.normal(jax.random.PRNGKey(2),
                                   (1, len(text) + 1, hidden_dim), jnp.float32)
    mask = jnp.ones((1, len(text) + 1), jnp.float32)

    # 1) NER branch: fused Features + Locate_Entity kernel
    _ = net.forward(text_seq, text, alias_data, entity_predict=None,
                    text_bert_features=bert_feats, mask_loss=mask)

    # 2) Linking branch with a known entity span: Features_Link + Link_KB kernels
    results = net.forward(text_seq, text, alias_data,
                          entity_predict=[("cde", 2, 4)])

    # block on a raw kernel output to ensure device execution completed
    ent_feats = net.get_features_link(text_seq)
    jax.block_until_ready(ent_feats)

    assert len(results) == 1 and results[0][1] == "cde"
    print("KERNEL_OK")
</pallas_src>

<mosaic_0001>
module attributes {stable_mosaic.version = 11 : i64} {
  func.func @_ner_fused_kernel(%arg0: i32, %arg1: memref<256x128xf32, #tpu.memory_space<vmem>>, %arg2: memref<3x128x128xbf16, #tpu.memory_space<vmem>>, %arg3: memref<3x1x128xf32, #tpu.memory_space<vmem>>, %arg4: memref<128x128xbf16, #tpu.memory_space<vmem>>, %arg5: memref<1x128xf32, #tpu.memory_space<vmem>>, %arg6: memref<256x128xf32, #tpu.memory_space<vmem>>) attributes {dimension_semantics = [#tpu.dimension_semantics<parallel>], iteration_bounds = array<i64: 1>, scalar_prefetch = 0 : i64, scratch_operands = 0 : i64, tpu.core_type = #tpu.core_type<tc>, window_params = [{transform_indices = @transform_0, window_bounds = array<i64: 256, 128>}, {pipeline_mode = #tpu.pipeline_mode<synchronous>, transform_indices = @transform_1, window_bounds = array<i64: 3, 128, 128>}, {pipeline_mode = #tpu.pipeline_mode<synchronous>, transform_indices = @transform_2, window_bounds = array<i64: 3, 1, 128>}, {pipeline_mode = #tpu.pipeline_mode<synchronous>, transform_indices = @transform_3, window_bounds = array<i64: 128, 128>}, {pipeline_mode = #tpu.pipeline_mode<synchronous>, transform_indices = @transform_4, window_bounds = array<i64: 1, 128>}, {transform_indices = @transform_5, window_bounds = array<i64: 256, 128>}]} {
    %c0 = arith.constant 0 : index
    %c0_0 = arith.constant 0 : index
    %0 = vector.load %arg1[%c0, %c0_0] : memref<256x128xf32, #tpu.memory_space<vmem>>, vector<256x128xf32>
    %1 = arith.truncf %0 : vector<256x128xf32> to vector<256x128xbf16>
    %c0_1 = arith.constant 0 : index
    %c0_2 = arith.constant 0 : index
    %c0_3 = arith.constant 0 : index
    %2 = vector.load %arg2[%c0_1, %c0_2, %c0_3] : memref<3x128x128xbf16, #tpu.memory_space<vmem>>, vector<1x128x128xbf16>
    %3 = vector.shape_cast %2 : vector<1x128x128xbf16> to vector<128x128xbf16>
    %cst = arith.constant dense<0.000000e+00> : vector<256x128xf32>
    %4 = tpu.matmul %1, %3, %cst {dimension_numbers = #tpu.dot_dimension_numbers<[1], [0], [0], [1], [0, 0, 1, 1], [], []>} : vector<256x128xbf16>, vector<128x128xbf16>, vector<256x128xf32> -> vector<256x128xf32>
    %c0_4 = arith.constant 0 : index
    %c0_5 = arith.constant 0 : index
    %c0_6 = arith.constant 0 : index
    %5 = vector.load %arg3[%c0_4, %c0_5, %c0_6] : memref<3x1x128xf32, #tpu.memory_space<vmem>>, vector<1x1x128xf32>
    %6 = vector.shape_cast %5 : vector<1x1x128xf32> to vector<1x128xf32>
    %7 = vector.broadcast %6 : vector<1x128xf32> to vector<256x128xf32>
    %8 = arith.addf %4, %7 : vector<256x128xf32>
    %cst_7 = arith.constant 0.000000e+00 : f32
    %9 = vector.broadcast %cst_7 : f32 to vector<256x128xf32>
    %10 = arith.maximumf %8, %9 : vector<256x128xf32>
    %11 = arith.truncf %10 : vector<256x128xf32> to vector<256x128xbf16>
    %c1 = arith.constant 1 : index
    %c0_8 = arith.constant 0 : index
    %c0_9 = arith.constant 0 : index
    %12 = vector.load %arg2[%c1, %c0_8, %c0_9] : memref<3x128x128xbf16, #tpu.memory_space<vmem>>, vector<1x128x128xbf16>
    %13 = vector.shape_cast %12 : vector<1x128x128xbf16> to vector<128x128xbf16>
    %cst_10 = arith.constant dense<0.000000e+00> : vector<256x128xf32>
    %14 = tpu.matmul %11, %13, %cst_10 {dimension_numbers = #tpu.dot_dimension_numbers<[1], [0], [0], [1], [0, 0, 1, 1], [], []>} : vector<256x128xbf16>, vector<128x128xbf16>, vector<256x128xf32> -> vector<256x128xf32>
    %c1_11 = arith.constant 1 : index
    %c0_12 = arith.constant 0 : index
    %c0_13 = arith.constant 0 : index
    %15 = vector.load %arg3[%c1_11, %c0_12, %c0_13] : memref<3x1x128xf32, #tpu.memory_space<vmem>>, vector<1x1x128xf32>
    %16 = vector.shape_cast %15 : vector<1x1x128xf32> to vector<1x128xf32>
    %17 = vector.broadcast %16 : vector<1x128xf32> to vector<256x128xf32>
    %18 = arith.addf %14, %17 : vector<256x128xf32>
    %cst_14 = arith.constant 0.000000e+00 : f32
    %19 = vector.broadcast %cst_14 : f32 to vector<256x128xf32>
    %20 = arith.maximumf %18, %19 : vector<256x128xf32>
    %21 = arith.truncf %20 : vector<256x128xf32> to vector<256x128xbf16>
    %c2 = arith.constant 2 : index
    %c0_15 = arith.constant 0 : index
    %c0_16 = arith.constant 0 : index
    %22 = vector.load %arg2[%c2, %c0_15, %c0_16] : memref<3x128x128xbf16, #tpu.memory_space<vmem>>, vector<1x128x128xbf16>
    %23 = vector.shape_cast %22 : vector<1x128x128xbf16> to vector<128x128xbf16>
    %cst_17 = arith.constant dense<0.000000e+00> : vector<256x128xf32>
    %24 = tpu.matmul %21, %23, %cst_17 {dimension_numbers = #tpu.dot_dimension_numbers<[1], [0], [0], [1], [0, 0, 1, 1], [], []>} : vector<256x128xbf16>, vector<128x128xbf16>, vector<256x128xf32> -> vector<256x128xf32>
    %c2_18 = arith.constant 2 : index
    %c0_19 = arith.constant 0 : index
    %c0_20 = arith.constant 0 : index
    %25 = vector.load %arg3[%c2_18, %c0_19, %c0_20] : memref<3x1x128xf32, #tpu.memory_space<vmem>>, vector<1x1x128xf32>
    %26 = vector.shape_cast %25 : vector<1x1x128xf32> to vector<1x128xf32>
    %27 = vector.broadcast %26 : vector<1x128xf32> to vector<256x128xf32>
    %28 = arith.addf %24, %27 : vector<256x128xf32>
    %cst_21 = arith.constant 0.000000e+00 : f32
    %29 = vector.broadcast %cst_21 : f32 to vector<256x128xf32>
    %30 = arith.maximumf %28, %29 : vector<256x128xf32>
    %31 = arith.truncf %30 : vector<256x128xf32> to vector<256x128xbf16>
    %c0_22 = arith.constant 0 : index
    %c0_23 = arith.constant 0 : index
    %32 = vector.load %arg4[%c0_22, %c0_23] : memref<128x128xbf16, #tpu.memory_space<vmem>>, vector<128x128xbf16>
    %cst_24 = arith.constant dense<0.000000e+00> : vector<256x128xf32>
    %33 = tpu.matmul %31, %32, %cst_24 {dimension_numbers = #tpu.dot_dimension_numbers<[1], [0], [0], [1], [0, 0, 1, 1], [], []>} : vector<256x128xbf16>, vector<128x128xbf16>, vector<256x128xf32> -> vector<256x128xf32>
    %c0_25 = arith.constant 0 : index
    %c0_26 = arith.constant 0 : index
    %34 = vector.load %arg5[%c0_25, %c0_26] : memref<1x128xf32, #tpu.memory_space<vmem>>, vector<1x128xf32>
    %35 = vector.broadcast %34 : vector<1x128xf32> to vector<256x128xf32>
    %36 = arith.addf %33, %35 : vector<256x128xf32>
    %c0_27 = arith.constant 0 : index
    %c0_28 = arith.constant 0 : index
    %37 = vector.load %arg6[%c0_27, %c0_28] : memref<256x128xf32, #tpu.memory_space<vmem>>, vector<256x128xf32>
    tpu.vector_store %arg6[%c0_27, %c0_28], %36 {strides = array<i32>} : memref<256x128xf32, #tpu.memory_space<vmem>>, vector<256x128xf32>,
    return
  }
  func.func @transform_0(%arg0: i32) -> (i32, i32) {
    %c0_i32 = arith.constant 0 : i32
    %c0_i32_0 = arith.constant 0 : i32
    return %arg0, %c0_i32 : i32, i32
  }
  func.func @transform_1(%arg0: i32) -> (i32, i32, i32) {
    %c0_i32 = arith.constant 0 : i32
    %c0_i32_0 = arith.constant 0 : i32
    %c0_i32_1 = arith.constant 0 : i32
    %c0_i32_2 = arith.constant 0 : i32
    return %c0_i32, %c0_i32_0, %c0_i32_1 : i32, i32, i32
  }
  func.func @transform_2(%arg0: i32) -> (i32, i32, i32) {
    %c0_i32 = arith.constant 0 : i32
    %c0_i32_0 = arith.constant 0 : i32
    %c0_i32_1 = arith.constant 0 : i32
    %c0_i32_2 = arith.constant 0 : i32
    return %c0_i32, %c0_i32_0, %c0_i32_1 : i32, i32, i32
  }
  func.func @transform_3(%arg0: i32) -> (i32, i32) {
    %c0_i32 = arith.constant 0 : i32
    %c0_i32_0 = arith.constant 0 : i32
    %c0_i32_1 = arith.constant 0 : i32
    return %c0_i32, %c0_i32_0 : i32, i32
  }
  func.func @transform_4(%arg0: i32) -> (i32, i32) {
    %c0_i32 = arith.constant 0 : i32
    %c0_i32_0 = arith.constant 0 : i32
    %c0_i32_1 = arith.constant 0 : i32
    return %c0_i32, %c0_i32_0 : i32, i32
  }
  func.func @transform_5(%arg0: i32) -> (i32, i32) {
    %c0_i32 = arith.constant 0 : i32
    %c0_i32_0 = arith.constant 0 : i32
    return %arg0, %c0_i32 : i32, i32
  }
}

</mosaic_0001>

<bundles_post_ra>
// kernel: tpu_custom_call.1
= control target key start
LH: loop header
LB: loop body
LE: loop exit
PB: predicated region body
PF: predicated region fallthrough
CT: control target
= control target key end

     0   :  { %10 = vsyncpa [#allocation3], 0  ;;  %s1943_s0 = inlined_call_operand.hbm [shape: f32[256,128], index: 0, kind: input, shape index: {}]   ;;  %s1944_s1 = inlined_call_operand.hbm [shape: bf16[3,128,128], index: 1, kind: input, shape index: {}]   ;;  %s1945_s2 = inlined_call_operand.vmem [shape: f32[3,1,128], index: 2, kind: input, shape index: {}]   ;;  %s1946_s3 = inlined_call_operand.hbm [shape: bf16[128,128], index: 3, kind: input, shape index: {}]   ;;  %s1947_s4 = inlined_call_operand.vmem [shape: f32[1,128], index: 4, kind: input, shape index: {}]   ;;  %s1948_s5 = inlined_call_operand.hbm [shape: f32[256,128], index: 5, kind: output, shape index: {}]  }
   0x1   :  { %11 = vsyncpa [#allocation6], 0 }
   0x2   :  { %12 = vsyncpa [#allocation4], 0  ;;  %s1697_s18 = smov [#allocation5]   ;;  %s1603_s22 = scalar_lea.hbm %s1944_s1, 3072 }
   0x3   :  { %s30_s19 = sshll.u32 %s1697_s18, 4  ;;  %p1604_p0 = scmp.ne.s32.totalorder %s1944_s1, %s1603_s22  ;;  %s31_s19 = int_to_ptr.vmem [resolvable:$true] %s30_s19 }
   0x4   :  { %p1607_p1 = scmp.lt.u32.totalorder %s1603_s22, %s1944_s1 }
   0x6   :  { %p1609_p2 = pnand %p1607_p1, %p1604_p0 }
   0x8   :  { %1612 = shalt.err (!%p1609_p2)
}
   0x9   :  { %s1613_s27 = scalar_lea.vmem %s31_s19, 3072  ;;  %p1618_p4 = scmp.lt.s32.totalorder %s31_s19, %s31_s19 }
   0xa   :  { %p1614_p3 = scmp.ne.s32.totalorder %s31_s19, %s1613_s27  ;;  %p1619_p5 = scmp.lt.s32.totalorder %s1613_s27, %s1613_s27 }
   0xc   :  { %p1620_p6 = por %p1619_p5, %p1618_p4 }
   0xe   :  { %p1621_p7 = pnand %p1620_p6, %p1614_p3 }
  0x10   :  { %1624 = shalt.err (!%p1621_p7)
}
  0x11   :  { %s1698_s28 = smov 64   ;;  %s1699_s29 = smov 4  }
  0x12   :  { %36 = dma.hbm_to_vmem [thread:$0]  %s1944_s1, 3072, %s31_s19, [#allocation6], %s1698_s28, %s1698_s28, %s1699_s29  }
  0x13   :  { %s1700_s7 = smov [#allocation2]   ;;  %s1625_s11 = scalar_lea.hbm %s1943_s0, 4096 }
  0x14   :  { %s18_s8 = sshll.u32 %s1700_s7, 4  ;;  %p1626_p8 = scmp.ne.s32.totalorder %s1943_s0, %s1625_s11  ;;  %s19_s8 = int_to_ptr.vmem [resolvable:$true] %s18_s8 }
  0x15   :  { %p1629_p9 = scmp.lt.u32.totalorder %s1625_s11, %s1943_s0 }
  0x17   :  { %p1631_p10 = pnand %p1629_p9, %p1626_p8 }
  0x19   :  { %1634 = shalt.err (!%p1631_p10)
}
  0x1a   :  { %s1635_s16 = scalar_lea.vmem %s19_s8, 4096  ;;  %p1640_p12 = scmp.lt.s32.totalorder %s19_s8, %s19_s8 }
  0x1b   :  { %p1636_p11 = scmp.ne.s32.totalorder %s19_s8, %s1635_s16  ;;  %p1641_p13 = scmp.lt.s32.totalorder %s1635_s16, %s1635_s16 }
  0x1d   :  { %p1642_p0 = por %p1641_p13, %p1640_p12 }
  0x1f   :  { %p1643_p1 = pnand %p1642_p0, %p1636_p11 }
  0x21   :  { %1646 = shalt.err (!%p1643_p1)
}
  0x22   :  { %s1701_s1 = smov 128   ;;  %s1702_s17 = smov 8  }
  0x23   :  { %24 = dma.hbm_to_vmem [thread:$0]  %s1943_s0, 4096, %s19_s8, [#allocation3], %s1701_s1, %s1701_s1, %s1702_s17  }
  0x24   :  { %s1703_s20 = smov [#allocation7]   ;;  %s1647_s24 = scalar_lea.hbm %s1946_s3, 1024 }
  0x25   :  { %s44_s21 = sshll.u32 %s1703_s20, 4  ;;  %p1648_p2 = scmp.ne.s32.totalorder %s1946_s3, %s1647_s24  ;;  %s45_s21 = int_to_ptr.vmem [resolvable:$true] %s44_s21 }
  0x26   :  { %p1651_p3 = scmp.lt.u32.totalorder %s1647_s24, %s1946_s3 }
  0x28   :  { %p1653_p4 = pnand %p1651_p3, %p1648_p2 }
  0x2a   :  { %1656 = shalt.err (!%p1653_p4)
}
  0x2b   :  { %s1657_s6 = scalar_lea.vmem %s45_s21, 1024  ;;  %p1662_p6 = scmp.lt.s32.totalorder %s45_s21, %s45_s21 }
  0x2c   :  { %p1658_p5 = scmp.ne.s32.totalorder %s45_s21, %s1657_s6  ;;  %p1663_p7 = scmp.lt.s32.totalorder %s1657_s6, %s1657_s6 }
  0x2e   :  { %p1664_p8 = por %p1663_p7, %p1662_p6 }
  0x30   :  { %p1665_p9 = pnand %p1664_p8, %p1658_p5 }
  0x32   :  { %1668 = shalt.err (!%p1665_p9)
}
  0x33   :  { %50 = dma.hbm_to_vmem [thread:$0]  %s1946_s3, 1024, %s45_s21, [#allocation6], %s1698_s28, %s1698_s28, %s1699_s29  }
  0x34   :  { %1691 = dma.done.wait [#allocation3], 4096  }
  0x35   :  { %1692 = vsyncadd [#allocation3], 4294963200 }
  0x36   :  { %1693 = dma.done.wait [#allocation6], 4096  }
  0x37   :  { %1694 = vsyncadd [#allocation6], 4294963200  ;;  %v1571_v0 = vld [vmem:[#allocation5] sm:$0xff]   ;;  %v1572_v1 = vld [vmem:[#allocation5 + $0x8] sm:$0xff]  }
  0x38   :  { %1371 = vmatprep.subr.bf16.mxu0 %v1571_v0  ;;  %v1573_v2 = vld [vmem:[#allocation5 + $0x10] sm:$0xff]   ;;  %v1574_v3 = vld [vmem:[#allocation5 + $0x18] sm:$0xff]   ;;  %v63_v4 = vld [vmem:[#allocation2] sm:$0xff] }
  0x39   :  { %1372 = vmatpush3.bf16.msra.mxu0 %v1571_v0  ;;  %v64_v5 = vld [vmem:[#allocation2 + $0x8] sm:$0xff]  ;;  %v1575_v7 = vld [vmem:[#allocation5 + $0x20] sm:$0xff]   ;;  %v1577_v9 = vld [vmem:[#allocation5 + $0x30] sm:$0xff]  }
  0x3a   :  { %1373 = vmatprep.subr.bf16.mxu0 %v1572_v1  ;;  %v95_v6 = vpack.c.bf16 %v64_v5, %v63_v4  ;;  %v1576_v8 = vld [vmem:[#allocation5 + $0x28] sm:$0xff]   ;;  %v1579_v10 = vld [vmem:[#allocation5 + $0x40] sm:$0xff]   ;;  %v1581_v12 = vld [vmem:[#allocation5 + $0x50] sm:$0xff]  }
  0x3b   :  { %v1580_v11 = vld [vmem:[#allocation5 + $0x48] sm:$0xff]   ;;  %1419 = vmatprep.subr.bf16.mxu1 %v1579_v10  ;;  %v1578_v13 = vld [vmem:[#allocation5 + $0x38] sm:$0xff]   ;;  %v65_v14 = vld [vmem:[#allocation2 + $0x10] sm:$0xff] }
  0x3c   :  { %1387 = vmatprep.mubr.bf16.mxu0 %v95_v6  ;;  %1420 = vmatpush3.bf16.msra.mxu1 %v1579_v10  ;;  %v66_v15 = vld [vmem:[#allocation2 + $0x18] sm:$0xff]  ;;  %v67_v17 = vld [vmem:[#allocation2 + $0x20] sm:$0xff]  ;;  %v68_v18 = vld [vmem:[#allocation2 + $0x28] sm:$0xff] }
  0x3d   :  { %1374 = vmatpush3.bf16.msra.mxu0 %v1572_v1  ;;  %1421 = vmatprep.subr.bf16.mxu1 %v1580_v11  ;;  %v1582_v16 = vld [vmem:[#allocation5 + $0x58] sm:$0xff]   ;;  %v1583_v19 = vld [vmem:[#allocation5 + $0x60] sm:$0xff]   ;;  %v96_v20 = vpack.c.bf16 %v66_v15, %v65_v14  ;;  %v97_v21 = vpack.c.bf16 %v68_v18, %v67_v17  ;;  %v69_v22 = vld [vmem:[#allocation2 + $0x30] sm:$0xff] }
  0x3e   :  { %1375 = vmatprep.subr.bf16.mxu0 %v1573_v2  ;;  %v70_v23 = vld [vmem:[#allocation2 + $0x38] sm:$0xff]  ;;  %v1584_v24 = vld [vmem:[#allocation5 + $0x68] sm:$0xff]   ;;  %v71_v25 = vld [vmem:[#allocation2 + $0x40] sm:$0xff] }
  0x3f   :  { %v72_v26 = vld [vmem:[#allocation2 + $0x48] sm:$0xff]  ;;  %v98_v27 = vpack.c.bf16 %v70_v23, %v69_v22  ;;  %v73_v29 = vld [vmem:[#allocation2 + $0x50] sm:$0xff]  ;;  %v74_v30 = vld [vmem:[#allocation2 + $0x58] sm:$0xff] }
  0x40   :  { %1422 = vmatpush3.bf16.msra.mxu1 %v1580_v11  ;;  %v99_v28 = vpack.c.bf16 %v72_v26, %v71_v25  ;;  %v75_v31 = vld [vmem:[#allocation2 + $0x60] sm:$0xff]  ;;  %v76_v32 = vld [vmem:[#allocation2 + $0x68] sm:$0xff]  ;;  %v100_v33 = vpack.c.bf16 %v74_v30, %v73_v29  ;;  %v77_v35 = vld [vmem:[#allocation2 + $0x70] sm:$0xff] }
  0x41   :  { %1376 = vmatpush3.bf16.msra.mxu0 %v1573_v2  ;;  %1423 = vmatprep.subr.bf16.mxu1 %v1581_v12  ;;  %v101_v34 = vpack.c.bf16 %v76_v32, %v75_v31  ;;  %v78_v36 = vld [vmem:[#allocation2 + $0x78] sm:$0xff]  ;;  %v79_v37 = vld [vmem:[#allocation2 + $0x80] sm:$0xff]  ;;  %v80_v38 = vld [vmem:[#allocation2 + $0x88] sm:$0xff] }
  0x42   :  { %1377 = vmatprep.subr.bf16.mxu0 %v1574_v3  ;;  %v102_v39 = vpack.c.bf16 %v78_v36, %v77_v35  ;;  %v103_v40 = vpack.c.bf16 %v80_v38, %v79_v37  ;;  %v81_v41 = vld [vmem:[#allocation2 + $0x90] sm:$0xff]  ;;  %v82_v42 = vld [vmem:[#allocation2 + $0x98] sm:$0xff]  ;;  %v83_v43 = vld [vmem:[#allocation2 + $0xa0] sm:$0xff] }
  0x43   :  { %v84_v44 = vld [vmem:[#allocation2 + $0xa8] sm:$0xff]  ;;  %v104_v45 = vpack.c.bf16 %v82_v42, %v81_v41  ;;  %v85_v47 = vld [vmem:[#allocation2 + $0xb0] sm:$0xff]  ;;  %v86_v48 = vld [vmem:[#allocation2 + $0xb8] sm:$0xff] }
  0x44   :  { %1424 = vmatpush3.bf16.msra.mxu1 %v1581_v12  ;;  %v105_v46 = vpack.c.bf16 %v84_v44, %v83_v43  ;;  %v87_v49 = vld [vmem:[#allocation2 + $0xc0] sm:$0xff]  ;;  %v88_v50 = vld [vmem:[#allocation2 + $0xc8] sm:$0xff]  ;;  %v106_v51 = vpack.c.bf16 %v86_v48, %v85_v47  ;;  %v89_v53 = vld [vmem:[#allocation2 + $0xd0] sm:$0xff] }
  0x45   :  { %1378 = vmatpush3.bf16.msra.mxu0 %v1574_v3  ;;  %1425 = vmatprep.subr.bf16.mxu1 %v1582_v16  ;;  %v107_v52 = vpack.c.bf16 %v88_v50, %v87_v49  ;;  %v90_v54 = vld [vmem:[#allocation2 + $0xd8] sm:$0xff]  ;;  %v91_v55 = vld [vmem:[#allocation2 + $0xe0] sm:$0xff]  ;;  %v92_v56 = vld [vmem:[#allocation2 + $0xe8] sm:$0xff] }
  0x46   :  { %1379 = vmatprep.subr.bf16.mxu0 %v1575_v7  ;;  %v108_v57 = vpack.c.bf16 %v90_v54, %v89_v53  ;;  %v109_v58 = vpack.c.bf16 %v92_v56, %v91_v55  ;;  %v93_v59 = vld [vmem:[#allocation2 + $0xf0] sm:$0xff]  ;;  %v94_v60 = vld [vmem:[#allocation2 + $0xf8] sm:$0xff]  ;;  %v1587_v0 = vld [vmem:[#allocation5 + $0x80] sm:$0xff]  }
  0x47   :  { %v110_v61 = vpack.c.bf16 %v94_v60, %v93_v59  ;;  %v1585_v62 = vld [vmem:[#allocation5 + $0x70] sm:$0xff]   ;;  %v1586_v63 = vld [vmem:[#allocation5 + $0x78] sm:$0xff]   ;;  %v1588_v1 = vld [vmem:[#allocation5 + $0x88] sm:$0xff]  }
  0x48   :  { %1426 = vmatpush3.bf16.msra.mxu1 %v1582_v16  ;;  %v1589_v2 = vld [vmem:[#allocation5 + $0x90] sm:$0xff]   ;;  %v1590_v3 = vld [vmem:[#allocation5 + $0x98] sm:$0xff]   ;;  %v1591_v4 = vld [vmem:[#allocation5 + $0xa0] sm:$0xff]  }
  0x49   :  { %1380 = vmatpush3.bf16.msra.mxu0 %v1575_v7  ;;  %1427 = vmatprep.subr.bf16.mxu1 %v1583_v19  ;;  %v1592_v5 = vld [vmem:[#allocation5 + $0xa8] sm:$0xff]   ;;  %v1593_v6 = vld [vmem:[#allocation5 + $0xb0] sm:$0xff]   ;;  %v1783_v7 = vld [vmem:[%s1945_s2] ss:$0 sm:$0xff] }
  0x4a   :  { %1381 = vmatprep.subr.bf16.mxu0 %v1576_v8 }
  0x4c   :  { %1428 = vmatpush3.bf16.msra.mxu1 %v1583_v19 }
  0x4d   :  { %1382 = vmatpush3.bf16.msra.mxu0 %v1576_v8  ;;  %1429 = vmatprep.subr.bf16.mxu1 %v1584_v24 }
  0x4e   :  { %1383 = vmatprep.subr.bf16.mxu0 %v1577_v9 }
  0x50   :  { %1430 = vmatpush3.bf16.msra.mxu1 %v1584_v24 }
  0x51   :  { %1384 = vmatpush3.bf16.msra.mxu0 %v1577_v9  ;;  %1431 = vmatprep.subr.bf16.mxu1 %v1585_v62 }
  0x52   :  { %1385 = vmatprep.subr.bf16.mxu0 %v1578_v13 }
  0x54   :  { %1432 = vmatpush3.bf16.msra.mxu1 %v1585_v62 }
  0x55   :  { %1386 = vmatpush3.bf16.msra.mxu0 %v1578_v13  ;;  %1433 = vmatprep.subr.bf16.mxu1 %v1586_v63 }
  0x56   :  { %1467 = vmatprep.subr.bf16.mxu0 %v1587_v0 }
  0x58   :  { %1388 = vmatmul.mubr.bf16.vlgmr.msra.gmra.mrb[0].mxu0 %v96_v20  ;;  %1434 = vmatpush3.bf16.msra.mxu1 %v1586_v63 }
  0x59   :  { %1391 = vmatprep.mubr.bf16.mxu0 %v97_v21  ;;  %1468 = vmatpush3.bf16.msra.mxu0 %v1587_v0 }
  0x5a   :  { %1469 = vmatprep.subr.bf16.mxu0 %v1588_v1 }
  0x5d   :  { %1470 = vmatpush3.bf16.msra.mxu0 %v1588_v1 }
  0x5e   :  { %1471 = vmatprep.subr.bf16.mxu0 %v1589_v2 }
  0x60   :  { %1392 = vmatmul.mubr.bf16.gmra.mrb[4].mxu0 %v98_v27 }
  0x61   :  { %1395 = vmatprep.mubr.bf16.mxu0 %v99_v28  ;;  %1472 = vmatpush3.bf16.msra.mxu0 %v1589_v2 }
  0x62   :  { %1473 = vmatprep.subr.bf16.mxu0 %v1590_v3 }
  0x65   :  { %1474 = vmatpush3.bf16.msra.mxu0 %v1590_v3 }
  0x66   :  { %1475 = vmatprep.subr.bf16.mxu0 %v1591_v4 }
  0x68   :  { %1396 = vmatmul.mubr.bf16.gmra.mrb[8].mxu0 %v100_v33 }
  0x69   :  { %1399 = vmatprep.mubr.bf16.mxu0 %v101_v34  ;;  %1476 = vmatpush3.bf16.msra.mxu0 %v1591_v4 }
  0x6a   :  { %1477 = vmatprep.subr.bf16.mxu0 %v1592_v5 }
  0x6d   :  { %1478 = vmatpush3.bf16.msra.mxu0 %v1592_v5 }
  0x6e   :  { %1479 = vmatprep.subr.bf16.mxu0 %v1593_v6 }
  0x70   :  { %1400 = vmatmul.mubr.bf16.gmra.mrb[12].mxu0 %v102_v39 }
  0x71   :  { %1403 = vmatprep.mubr.bf16.mxu0 %v103_v40  ;;  %1480 = vmatpush3.bf16.msra.mxu0 %v1593_v6 }
  0x78   :  { %1404 = vmatmul.mubr.bf16.gmra.mrb[16].mxu0 %v104_v45 }
  0x79   :  { %1407 = vmatprep.mubr.bf16.mxu0 %v105_v46 }
  0x80   :  { %1408 = vmatmul.mubr.bf16.gmra.mrb[20].mxu0 %v106_v51 }
  0x81   :  { %1411 = vmatprep.mubr.bf16.mxu0 %v107_v52 }
  0x88   :  { %1412 = vmatmul.mubr.bf16.gmra.mrb[24].mxu0 %v108_v57 }
  0x89   :  { %1415 = vmatprep.mubr.bf16.mxu0 %v109_v58 }
  0x90   :  { %1416 = vmatmul.mubr.bf16.gmra.mrb[28].mxu0 %v110_v61 }
 0x12b   :  { %v1389_v8 = vpop.f32.mrb[0].mxu0 }
 0x12c   :  { %v225_v9 = vadd.f32 %v1389_v8, %v1783_v7  ;;  %v216_v10 = vpop.f32.mrb[1].mxu0 }
 0x12d   :  { %v217_v11 = vadd.f32 %v1783_v7, %v216_v10  ;;  %v1390_v12 = vpop.f32.mrb[2].mxu0 }
 0x12e   :  { %v228_v13 = vadd.f32 %v1390_v12, %v1783_v7  ;;  %v219_v14 = vpop.f32.mrb[3].mxu0  ;;  %v345_v16 = vmax.f32 %v225_v9, 0.0 }
 0x12f   :  { %v220_v15 = vadd.f32 %v1783_v7, %v219_v14  ;;  %v343_v18 = vmax.f32 %v217_v11, 0.0 }
 0x130   :  { %v346_v17 = vmax.f32 %v228_v13, 0.0 }
 0x131   :  { %v344_v19 = vmax.f32 %v220_v15, 0.0 }
 0x132   :  { %v376_v20 = vpack.c.bf16 %v346_v17, %v345_v16 }
 0x133   :  { %v1393_v21 = vpop.f32.mrb[4].mxu0  ;;  %v375_v22 = vpack.c.bf16 %v344_v19, %v343_v18 }
 0x134   :  { %v241_v23 = vadd.f32 %v1393_v21, %v1783_v7  ;;  %v232_v24 = vpop.f32.mrb[5].mxu0 }
 0x135   :  { %v233_v25 = vadd.f32 %v1783_v7, %v232_v24  ;;  %v1394_v26 = vpop.f32.mrb[6].mxu0  ;;  %1435 = vmatprep.mubr.bf16.mxu1 %v375_v22 }
 0x136   :  { %v244_v27 = vadd.f32 %v1394_v26, %v1783_v7  ;;  %v235_v28 = vpop.f32.mrb[7].mxu0  ;;  %1436 = vmatmul.mubr.bf16.vlgmr.msra.gmra.mrb[0].mxu1 %v376_v20  ;;  %v349_v30 = vmax.f32 %v241_v23, 0.0 }
 0x137   :  { %v236_v29 = vadd.f32 %v1783_v7, %v235_v28  ;;  %v347_v32 = vmax.f32 %v233_v25, 0.0 }
 0x138   :  { %v350_v31 = vmax.f32 %v244_v27, 0.0 }
 0x139   :  { %v348_v33 = vmax.f32 %v236_v29, 0.0 }
 0x13a   :  { %v378_v34 = vpack.c.bf16 %v350_v31, %v349_v30 }
 0x13b   :  { %v377_v35 = vpack.c.bf16 %v348_v33, %v347_v32  ;;  %v1397_v36 = vpop.f32.mrb[8].mxu0 }
 0x13c   :  { %v257_v37 = vadd.f32 %v1397_v36, %v1783_v7  ;;  %v248_v38 = vpop.f32.mrb[9].mxu0 }
 0x13d   :  { %v249_v39 = vadd.f32 %v1783_v7, %v248_v38  ;;  %v1398_v40 = vpop.f32.mrb[10].mxu0  ;;  %1439 = vmatprep.mubr.bf16.mxu1 %v377_v35 }
 0x13e   :  { %v260_v41 = vadd.f32 %v1398_v40, %v1783_v7  ;;  %v251_v42 = vpop.f32.mrb[11].mxu0  ;;  %1440 = vmatmul.mubr.bf16.gmra.mrb[4].mxu1 %v378_v34  ;;  %v353_v44 = vmax.f32 %v257_v37, 0.0 }
 0x13f   :  { %v252_v43 = vadd.f32 %v1783_v7, %v251_v42  ;;  %v351_v46 = vmax.f32 %v249_v39, 0.0 }
 0x140   :  { %v354_v45 = vmax.f32 %v260_v41, 0.0 }
 0x141   :  { %v352_v47 = vmax.f32 %v252_v43, 0.0 }
 0x142   :  { %v380_v48 = vpack.c.bf16 %v354_v45, %v353_v44 }
 0x143   :  { %v379_v49 = vpack.c.bf16 %v352_v47, %v351_v46  ;;  %v1401_v50 = vpop.f32.mrb[12].mxu0 }
 0x144   :  { %v273_v51 = vadd.f32 %v1401_v50, %v1783_v7  ;;  %v264_v52 = vpop.f32.mrb[13].mxu0 }
 0x145   :  { %v265_v53 = vadd.f32 %v1783_v7, %v264_v52  ;;  %v1402_v54 = vpop.f32.mrb[14].mxu0  ;;  %1443 = vmatprep.mubr.bf16.mxu1 %v379_v49 }
 0x146   :  { %v276_v55 = vadd.f32 %v1402_v54, %v1783_v7  ;;  %v267_v56 = vpop.f32.mrb[15].mxu0  ;;  %1444 = vmatmul.mubr.bf16.gmra.mrb[8].mxu1 %v380_v48  ;;  %v357_v58 = vmax.f32 %v273_v51, 0.0 }
 0x147   :  { %v268_v57 = vadd.f32 %v1783_v7, %v267_v56  ;;  %v355_v60 = vmax.f32 %v265_v53, 0.0 }
 0x148   :  { %v358_v59 = vmax.f32 %v276_v55, 0.0 }
 0x149   :  { %v356_v61 = vmax.f32 %v268_v57, 0.0  ;;  %v1594_v57 = vld [vmem:[#allocation5 + $0xb8] sm:$0xff]  }
 0x14a   :  { %v382_v62 = vpack.c.bf16 %v358_v59, %v357_v58  ;;  %1481 = vmatprep.subr.bf16.mxu0 %v1594_v57  ;;  %v1595_v58 = vld [vmem:[#allocation7] sm:$0xff]   ;;  %v1596_v59 = vld [vmem:[#allocation7 + $0x8] sm:$0xff]  }
 0x14b   :  { %v381_v63 = vpack.c.bf16 %v356_v61, %v355_v60  ;;  %v1405_v0 = vpop.f32.mrb[16].mxu0  ;;  %1482 = vmatpush3.bf16.msra.mxu0 %v1594_v57  ;;  %1515 = vmatprep.subr.bf16.mxu1 %v1595_v58  ;;  %v1597_v60 = vld [vmem:[#allocation7 + $0x10] sm:$0xff]   ;;  %v1599_v61 = vld [vmem:[#allocation7 + $0x20] sm:$0xff]  }
 0x14c   :  { %v289_v1 = vadd.f32 %v1405_v0, %v1783_v7  ;;  %v280_v2 = vpop.f32.mrb[17].mxu0  ;;  %1516 = vmatpush3.bf16.msra.mxu1 %v1595_v58  ;;  %v1820_v0 = vld [vmem:[%s1945_s2 + $0x1] ss:$0 sm:$0xff] }
 0x14d   :  { %v281_v3 = vadd.f32 %v1783_v7, %v280_v2  ;;  %v1406_v4 = vpop.f32.mrb[18].mxu0  ;;  %1447 = vmatprep.mubr.bf16.mxu1 %v381_v63  ;;  %1517 = vmatprep.subr.bf16.mxu1 %v1596_v59  ;;  %v1601_v63 = vld [vmem:[#allocation7 + $0x30] sm:$0xff]  }
 0x14e   :  { %v292_v5 = vadd.f32 %v1406_v4, %v1783_v7  ;;  %v283_v6 = vpop.f32.mrb[19].mxu0  ;;  %1448 = vmatmul.mubr.bf16.gmra.mrb[12].mxu1 %v382_v62  ;;  %v361_v9 = vmax.f32 %v289_v1, 0.0  ;;  %v1600_v62 = vld [vmem:[#allocation7 + $0x28] sm:$0xff]  }
 0x14f   :  { %v284_v8 = vadd.f32 %v1783_v7, %v283_v6  ;;  %v359_v11 = vmax.f32 %v281_v3, 0.0 }
 0x150   :  { %v362_v10 = vmax.f32 %v292_v5, 0.0  ;;  %1518 = vmatpush3.bf16.msra.mxu1 %v1596_v59 }
 0x151   :  { %v360_v12 = vmax.f32 %v284_v8, 0.0  ;;  %1519 = vmatprep.subr.bf16.mxu1 %v1597_v60 }
 0x152   :  { %v384_v13 = vpack.c.bf16 %v362_v10, %v361_v9 }
 0x153   :  { %v383_v14 = vpack.c.bf16 %v360_v12, %v359_v11  ;;  %v1409_v15 = vpop.f32.mrb[20].mxu0 }
 0x154   :  { %v305_v16 = vadd.f32 %v1409_v15, %v1783_v7  ;;  %v296_v17 = vpop.f32.mrb[21].mxu0  ;;  %1520 = vmatpush3.bf16.msra.mxu1 %v1597_v60 }
 0x155   :  { %v297_v18 = vadd.f32 %v1783_v7, %v296_v17  ;;  %v1410_v19 = vpop.f32.mrb[22].mxu0  ;;  %1451 = vmatprep.mubr.bf16.mxu1 %v383_v14 }
 0x156   :  { %v308_v20 = vadd.f32 %v1410_v19, %v1783_v7  ;;  %v299_v21 = vpop.f32.mrb[23].mxu0  ;;  %1452 = vmatmul.mubr.bf16.gmra.mrb[16].mxu1 %v384_v13  ;;  %v365_v23 = vmax.f32 %v305_v16, 0.0 }
 0x157   :  { %v300_v22 = vadd.f32 %v1783_v7, %v299_v21  ;;  %v363_v25 = vmax.f32 %v297_v18, 0.0 }
 0x158   :  { %v366_v24 = vmax.f32 %v308_v20, 0.0 }
 0x159   :  { %v364_v26 = vmax.f32 %v300_v22, 0.0 }
 0x15a   :  { %v386_v27 = vpack.c.bf16 %v366_v24, %v365_v23 }
 0x15b   :  { %v385_v28 = vpack.c.bf16 %v364_v26, %v363_v25  ;;  %v1413_v29 = vpop.f32.mrb[24].mxu0 }
 0x15c   :  { %v321_v30 = vadd.f32 %v1413_v29, %v1783_v7  ;;  %v312_v31 = vpop.f32.mrb[25].mxu0 }
 0x15d   :  { %v313_v32 = vadd.f32 %v1783_v7, %v312_v31  ;;  %v1414_v33 = vpop.f32.mrb[26].mxu0  ;;  %1455 = vmatprep.mubr.bf16.mxu1 %v385_v28 }
 0x15e   :  { %v324_v34 = vadd.f32 %v1414_v33, %v1783_v7  ;;  %v315_v35 = vpop.f32.mrb[27].mxu0  ;;  %1456 = vmatmul.mubr.bf16.gmra.mrb[20].mxu1 %v386_v27  ;;  %v369_v37 = vmax.f32 %v321_v30, 0.0 }
 0x15f   :  { %v316_v36 = vadd.f32 %v1783_v7, %v315_v35  ;;  %v367_v39 = vmax.f32 %v313_v32, 0.0 }
 0x160   :  { %v370_v38 = vmax.f32 %v324_v34, 0.0 }
 0x161   :  { %v368_v40 = vmax.f32 %v316_v36, 0.0 }
 0x162   :  { %v388_v41 = vpack.c.bf16 %v370_v38, %v369_v37 }
 0x163   :  { %v387_v42 = vpack.c.bf16 %v368_v40, %v367_v39  ;;  %v1417_v43 = vpop.f32.mrb[28].mxu0 }
 0x164   :  { %v337_v44 = vadd.f32 %v1417_v43, %v1783_v7  ;;  %v328_v45 = vpop.f32.mrb[29].mxu0 }
 0x165   :  { %v329_v46 = vadd.f32 %v1783_v7, %v328_v45  ;;  %v1418_v47 = vpop.f32.mrb[30].mxu0  ;;  %1459 = vmatprep.mubr.bf16.mxu1 %v387_v42 }
 0x166   :  { %v340_v48 = vadd.f32 %v1418_v47, %v1783_v7  ;;  %v331_v49 = vpop.f32.mrb[31].mxu0  ;;  %1460 = vmatmul.mubr.bf16.gmra.mrb[24].mxu1 %v388_v41  ;;  %v373_v51 = vmax.f32 %v337_v44, 0.0 }
 0x167   :  { %v332_v50 = vadd.f32 %v1783_v7, %v331_v49  ;;  %v371_v53 = vmax.f32 %v329_v46, 0.0  ;;  %v1598_v7 = vld [vmem:[#allocation7 + $0x18] sm:$0xff]  }
 0x168   :  { %v374_v52 = vmax.f32 %v340_v48, 0.0  ;;  %1521 = vmatprep.subr.bf16.mxu1 %v1598_v7 }
 0x169   :  { %v372_v54 = vmax.f32 %v332_v50, 0.0  ;;  %1522 = vmatpush3.bf16.msra.mxu1 %v1598_v7 }
 0x16a   :  { %v390_v55 = vpack.c.bf16 %v374_v52, %v373_v51  ;;  %1523 = vmatprep.subr.bf16.mxu1 %v1599_v61 }
 0x16b   :  { %v389_v56 = vpack.c.bf16 %v372_v54, %v371_v53 }
 0x16d   :  { %1463 = vmatprep.mubr.bf16.mxu1 %v389_v56  ;;  %1524 = vmatpush3.bf16.msra.mxu1 %v1599_v61 }
 0x16e   :  { %1464 = vmatmul.mubr.bf16.gmra.mrb[28].mxu1 %v390_v55  ;;  %1525 = vmatprep.subr.bf16.mxu1 %v1600_v62 }
 0x171   :  { %1526 = vmatpush3.bf16.msra.mxu1 %v1600_v62 }
 0x172   :  { %1527 = vmatprep.subr.bf16.mxu1 %v1601_v63 }
 0x175   :  { %1528 = vmatpush3.bf16.msra.mxu1 %v1601_v63 }
 0x209   :  { %v1437_v1 = vpop.f32.mrb[0].mxu1 }
 0x20a   :  { %v507_v2 = vadd.f32 %v1437_v1, %v1820_v0  ;;  %v498_v3 = vpop.f32.mrb[1].mxu1 }
 0x20b   :  { %v499_v4 = vadd.f32 %v1820_v0, %v498_v3  ;;  %v1438_v5 = vpop.f32.mrb[2].mxu1 }
 0x20c   :  { %v510_v6 = vadd.f32 %v1438_v5, %v1820_v0  ;;  %v501_v8 = vpop.f32.mrb[3].mxu1  ;;  %v627_v10 = vmax.f32 %v507_v2, 0.0 }
 0x20d   :  { %v502_v9 = vadd.f32 %v1820_v0, %v501_v8  ;;  %v625_v12 = vmax.f32 %v499_v4, 0.0 }
 0x20e   :  { %v628_v11 = vmax.f32 %v510_v6, 0.0 }
 0x20f   :  { %v626_v13 = vmax.f32 %v502_v9, 0.0 }
 0x210   :  { %v658_v14 = vpack.c.bf16 %v628_v11, %v627_v10 }
 0x211   :  { %v657_v15 = vpack.c.bf16 %v626_v13, %v625_v12  ;;  %v1441_v16 = vpop.f32.mrb[4].mxu1 }
 0x212   :  { %v523_v17 = vadd.f32 %v1441_v16, %v1820_v0  ;;  %v514_v18 = vpop.f32.mrb[5].mxu1 }
 0x213   :  { %v515_v19 = vadd.f32 %v1820_v0, %v514_v18  ;;  %v1442_v20 = vpop.f32.mrb[6].mxu1  ;;  %1483 = vmatprep.mubr.bf16.mxu0 %v657_v15 }
 0x214   :  { %v526_v21 = vadd.f32 %v1442_v20, %v1820_v0  ;;  %v517_v22 = vpop.f32.mrb[7].mxu1  ;;  %1484 = vmatmul.mubr.bf16.vlgmr.msra.gmra.mrb[32].mxu0 %v658_v14  ;;  %v631_v24 = vmax.f32 %v523_v17, 0.0 }
 0x215   :  { %v518_v23 = vadd.f32 %v1820_v0, %v517_v22  ;;  %v629_v26 = vmax.f32 %v515_v19, 0.0 }
 0x216   :  { %v632_v25 = vmax.f32 %v526_v21, 0.0 }
 0x217   :  { %v630_v27 = vmax.f32 %v518_v23, 0.0 }
 0x218   :  { %v660_v28 = vpack.c.bf16 %v632_v25, %v631_v24 }
 0x219   :  { %v659_v29 = vpack.c.bf16 %v630_v27, %v629_v26  ;;  %v1445_v30 = vpop.f32.mrb[8].mxu1 }
 0x21a   :  { %v539_v31 = vadd.f32 %v1445_v30, %v1820_v0  ;;  %v530_v32 = vpop.f32.mrb[9].mxu1 }
 0x21b   :  { %v531_v33 = vadd.f32 %v1820_v0, %v530_v32  ;;  %v1446_v34 = vpop.f32.mrb[10].mxu1  ;;  %1487 = vmatprep.mubr.bf16.mxu0 %v659_v29 }
 0x21c   :  { %v542_v35 = vadd.f32 %v1446_v34, %v1820_v0  ;;  %v533_v36 = vpop.f32.mrb[11].mxu1  ;;  %1488 = vmatmul.mubr.bf16.gmra.mrb[36].mxu0 %v660_v28  ;;  %v635_v38 = vmax.f32 %v539_v31, 0.0 }
 0x21d   :  { %v534_v37 = vadd.f32 %v1820_v0, %v533_v36  ;;  %v633_v40 = vmax.f32 %v531_v33, 0.0 }
 0x21e   :  { %v636_v39 = vmax.f32 %v542_v35, 0.0 }
 0x21f   :  { %v634_v41 = vmax.f32 %v534_v37, 0.0 }
 0x220   :  { %v662_v42 = vpack.c.bf16 %v636_v39, %v635_v38 }
 0x221   :  { %v661_v43 = vpack.c.bf16 %v634_v41, %v633_v40  ;;  %v1449_v44 = vpop.f32.mrb[12].mxu1 }
 0x222   :  { %v555_v45 = vadd.f32 %v1449_v44, %v1820_v0  ;;  %v546_v46 = vpop.f32.mrb[13].mxu1 }
 0x223   :  { %v547_v47 = vadd.f32 %v1820_v0, %v546_v46  ;;  %v1450_v48 = vpop.f32.mrb[14].mxu1  ;;  %1491 = vmatprep.mubr.bf16.mxu0 %v661_v43 }
 0x224   :  { %v558_v49 = vadd.f32 %v1450_v48, %v1820_v0  ;;  %v549_v50 = vpop.f32.mrb[15].mxu1  ;;  %1492 = vmatmul.mubr.bf16.gmra.mrb[40].mxu0 %v662_v42  ;;  %v639_v52 = vmax.f32 %v555_v45, 0.0 }
 0x225   :  { %v550_v51 = vadd.f32 %v1820_v0, %v549_v50  ;;  %v637_v54 = vmax.f32 %v547_v47, 0.0 }
 0x226   :  { %v640_v53 = vmax.f32 %v558_v49, 0.0 }
 0x227   :  { %v638_v55 = vmax.f32 %v550_v51, 0.0  ;;  %v1602_v51 = vld [vmem:[#allocation7 + $0x38] sm:$0xff]  }
 0x228   :  { %v664_v56 = vpack.c.bf16 %v640_v53, %v639_v52  ;;  %1529 = vmatprep.subr.bf16.mxu1 %v1602_v51  ;;  %v1857_v52 = vld [vmem:[%s1945_s2 + $0x2] ss:$0 sm:$0xff] }
 0x229   :  { %v663_v57 = vpack.c.bf16 %v638_v55, %v637_v54  ;;  %v1453_v58 = vpop.f32.mrb[16].mxu1  ;;  %1530 = vmatpush3.bf16.msra.mxu1 %v1602_v51 }
 0x22a   :  { %v571_v59 = vadd.f32 %v1453_v58, %v1820_v0  ;;  %v562_v60 = vpop.f32.mrb[17].mxu1 }
 0x22b   :  { %v563_v7 = vadd.f32 %v1820_v0, %v562_v60  ;;  %v1454_v61 = vpop.f32.mrb[18].mxu1  ;;  %1495 = vmatprep.mubr.bf16.mxu0 %v663_v57 }
 0x22c   :  { %v574_v62 = vadd.f32 %v1454_v61, %v1820_v0  ;;  %v565_v63 = vpop.f32.mrb[19].mxu1  ;;  %1496 = vmatmul.mubr.bf16.gmra.mrb[44].mxu0 %v664_v56  ;;  %v643_v2 = vmax.f32 %v571_v59, 0.0 }
 0x22d   :  { %v566_v1 = vadd.f32 %v1820_v0, %v565_v63  ;;  %v641_v4 = vmax.f32 %v563_v7, 0.0 }
 0x22e   :  { %v644_v3 = vmax.f32 %v574_v62, 0.0 }
 0x22f   :  { %v642_v5 = vmax.f32 %v566_v1, 0.0 }
 0x230   :  { %v666_v6 = vpack.c.bf16 %v644_v3, %v643_v2 }
 0x231   :  { %v665_v8 = vpack.c.bf16 %v642_v5, %v641_v4  ;;  %v1457_v9 = vpop.f32.mrb[20].mxu1 }
 0x232   :  { %v587_v10 = vadd.f32 %v1457_v9, %v1820_v0  ;;  %v578_v11 = vpop.f32.mrb[21].mxu1 }
 0x233   :  { %v579_v12 = vadd.f32 %v1820_v0, %v578_v11  ;;  %v1458_v13 = vpop.f32.mrb[22].mxu1  ;;  %1499 = vmatprep.mubr.bf16.mxu0 %v665_v8 }
 0x234   :  { %v590_v14 = vadd.f32 %v1458_v13, %v1820_v0  ;;  %v581_v15 = vpop.f32.mrb[23].mxu1  ;;  %1500 = vmatmul.mubr.bf16.gmra.mrb[48].mxu0 %v666_v6  ;;  %v647_v17 = vmax.f32 %v587_v10, 0.0 }
 0x235   :  { %v582_v16 = vadd.f32 %v1820_v0, %v581_v15  ;;  %v645_v19 = vmax.f32 %v579_v12, 0.0 }
 0x236   :  { %v648_v18 = vmax.f32 %v590_v14, 0.0 }
 0x237   :  { %v646_v20 = vmax.f32 %v582_v16, 0.0 }
 0x238   :  { %v668_v21 = vpack.c.bf16 %v648_v18, %v647_v17 }
 0x239   :  { %v667_v22 = vpack.c.bf16 %v646_v20, %v645_v19  ;;  %v1461_v23 = vpop.f32.mrb[24].mxu1 }
 0x23a   :  { %v603_v24 = vadd.f32 %v1461_v23, %v1820_v0  ;;  %v594_v25 = vpop.f32.mrb[25].mxu1 }
 0x23b   :  { %v595_v26 = vadd.f32 %v1820_v0, %v594_v25  ;;  %v1462_v27 = vpop.f32.mrb[26].mxu1  ;;  %1503 = vmatprep.mubr.bf16.mxu0 %v667_v22 }
 0x23c   :  { %v606_v28 = vadd.f32 %v1462_v27, %v1820_v0  ;;  %v597_v29 = vpop.f32.mrb[27].mxu1  ;;  %1504 = vmatmul.mubr.bf16.gmra.mrb[52].mxu0 %v668_v21  ;;  %v651_v31 = vmax.f32 %v603_v24, 0.0 }
 0x23d   :  { %v598_v30 = vadd.f32 %v1820_v0, %v597_v29  ;;  %v649_v33 = vmax.f32 %v595_v26, 0.0 }
 0x23e   :  { %v652_v32 = vmax.f32 %v606_v28, 0.0 }
 0x23f   :  { %v650_v34 = vmax.f32 %v598_v30, 0.0 }
 0x240   :  { %v670_v35 = vpack.c.bf16 %v652_v32, %v651_v31 }
 0x241   :  { %v669_v36 = vpack.c.bf16 %v650_v34, %v649_v33  ;;  %v1465_v37 = vpop.f32.mrb[28].mxu1 }
 0x242   :  { %v619_v38 = vadd.f32 %v1465_v37, %v1820_v0  ;;  %v610_v39 = vpop.f32.mrb[29].mxu1 }
 0x243   :  { %v611_v40 = vadd.f32 %v1820_v0, %v610_v39  ;;  %v1466_v41 = vpop.f32.mrb[30].mxu1  ;;  %1507 = vmatprep.mubr.bf16.mxu0 %v669_v36 }
 0x244   :  { %v622_v42 = vadd.f32 %v1466_v41, %v1820_v0  ;;  %v613_v43 = vpop.f32.mrb[31].mxu1  ;;  %1508 = vmatmul.mubr.bf16.gmra.mrb[56].mxu0 %v670_v35  ;;  %v655_v45 = vmax.f32 %v619_v38, 0.0 }
 0x245   :  { %v614_v44 = vadd.f32 %v1820_v0, %v613_v43  ;;  %v653_v47 = vmax.f32 %v611_v40, 0.0 }
 0x246   :  { %v656_v46 = vmax.f32 %v622_v42, 0.0 }
 0x247   :  { %v654_v48 = vmax.f32 %v614_v44, 0.0 }
 0x248   :  { %v672_v49 = vpack.c.bf16 %v656_v46, %v655_v45 }
 0x249   :  { %v671_v50 = vpack.c.bf16 %v654_v48, %v653_v47 }
 0x24b   :  { %1511 = vmatprep.mubr.bf16.mxu0 %v671_v50 }
 0x24c   :  { %1512 = vmatmul.mubr.bf16.gmra.mrb[60].mxu0 %v672_v49 }
 0x2e7   :  { %v1485_v53 = vpop.f32.mrb[32].mxu0 }
 0x2e8   :  { %v789_v54 = vadd.f32 %v1485_v53, %v1857_v52  ;;  %v780_v0 = vpop.f32.mrb[33].mxu0 }
 0x2e9   :  { %v781_v55 = vadd.f32 %v1857_v52, %v780_v0  ;;  %v1486_v56 = vpop.f32.mrb[34].mxu0 }
 0x2ea   :  { %v792_v57 = vadd.f32 %v1486_v56, %v1857_v52  ;;  %v783_v58 = vpop.f32.mrb[35].mxu0  ;;  %v909_v60 = vmax.f32 %v789_v54, 0.0 }
 0x2eb   :  { %v784_v59 = vadd.f32 %v1857_v52, %v783_v58  ;;  %v907_v61 = vmax.f32 %v781_v55, 0.0 }
 0x2ec   :  { %v910_v7 = vmax.f32 %v792_v57, 0.0 }
 0x2ed   :  { %v908_v62 = vmax.f32 %v784_v59, 0.0 }
 0x2ee   :  { %v940_v63 = vpack.c.bf16 %v910_v7, %v909_v60 }
 0x2ef   :  { %v939_v1 = vpack.c.bf16 %v908_v62, %v907_v61  ;;  %v1489_v2 = vpop.f32.mrb[36].mxu0 }
 0x2f0   :  { %v805_v3 = vadd.f32 %v1489_v2, %v1857_v52  ;;  %v796_v4 = vpop.f32.mrb[37].mxu0 }
 0x2f1   :  { %v797_v5 = vadd.f32 %v1857_v52, %v796_v4  ;;  %v1490_v6 = vpop.f32.mrb[38].mxu0  ;;  %1531 = vmatprep.mubr.bf16.mxu1 %v939_v1 }
 0x2f2   :  { %v808_v8 = vadd.f32 %v1490_v6, %v1857_v52  ;;  %v799_v9 = vpop.f32.mrb[39].mxu0  ;;  %1532 = vmatmul.mubr.bf16.vlgmr.msra.gmra.mrb[32].mxu1 %v940_v63  ;;  %v913_v11 = vmax.f32 %v805_v3, 0.0 }
 0x2f3   :  { %v800_v10 = vadd.f32 %v1857_v52, %v799_v9  ;;  %v911_v13 = vmax.f32 %v797_v5, 0.0 }
 0x2f4   :  { %v914_v12 = vmax.f32 %v808_v8, 0.0 }
 0x2f5   :  { %v912_v14 = vmax.f32 %v800_v10, 0.0 }
 0x2f6   :  { %v942_v15 = vpack.c.bf16 %v914_v12, %v913_v11 }
 0x2f7   :  { %v941_v16 = vpack.c.bf16 %v912_v14, %v911_v13  ;;  %v1493_v17 = vpop.f32.mrb[40].mxu0 }
 0x2f8   :  { %v821_v18 = vadd.f32 %v1493_v17, %v1857_v52  ;;  %v812_v19 = vpop.f32.mrb[41].mxu0 }
 0x2f9   :  { %v813_v20 = vadd.f32 %v1857_v52, %v812_v19  ;;  %v1494_v21 = vpop.f32.mrb[42].mxu0  ;;  %1535 = vmatprep.mubr.bf16.mxu1 %v941_v16 }
 0x2fa   :  { %v824_v22 = vadd.f32 %v1494_v21, %v1857_v52  ;;  %v815_v23 = vpop.f32.mrb[43].mxu0  ;;  %1536 = vmatmul.mubr.bf16.gmra.mrb[36].mxu1 %v942_v15  ;;  %v917_v25 = vmax.f32 %v821_v18, 0.0 }
 0x2fb   :  { %v816_v24 = vadd.f32 %v1857_v52, %v815_v23  ;;  %v915_v27 = vmax.f32 %v813_v20, 0.0 }
 0x2fc   :  { %v918_v26 = vmax.f32 %v824_v22, 0.0 }
 0x2fd   :  { %v916_v28 = vmax.f32 %v816_v24, 0.0 }
 0x2fe   :  { %v944_v29 = vpack.c.bf16 %v918_v26, %v917_v25 }
 0x2ff   :  { %v943_v30 = vpack.c.bf16 %v916_v28, %v915_v27  ;;  %v1497_v31 = vpop.f32.mrb[44].mxu0 }
 0x300   :  { %v837_v32 = vadd.f32 %v1497_v31, %v1857_v52  ;;  %v828_v33 = vpop.f32.mrb[45].mxu0 }
 0x301   :  { %v829_v34 = vadd.f32 %v1857_v52, %v828_v33  ;;  %v1498_v35 = vpop.f32.mrb[46].mxu0  ;;  %1539 = vmatprep.mubr.bf16.mxu1 %v943_v30 }
 0x302   :  { %v840_v36 = vadd.f32 %v1498_v35, %v1857_v52  ;;  %v831_v37 = vpop.f32.mrb[47].mxu0  ;;  %1540 = vmatmul.mubr.bf16.gmra.mrb[40].mxu1 %v944_v29  ;;  %v921_v39 = vmax.f32 %v837_v32, 0.0 }
 0x303   :  { %v832_v38 = vadd.f32 %v1857_v52, %v831_v37  ;;  %v919_v41 = vmax.f32 %v829_v34, 0.0 }
 0x304   :  { %v922_v40 = vmax.f32 %v840_v36, 0.0 }
 0x305   :  { %v920_v42 = vmax.f32 %v832_v38, 0.0  ;;  %v1894_v38 = vld [vmem:[%s1947_s4] ss:$0 sm:$0xff]  ;;  %s1704_s4 = smov [#allocation8]  }
 0x306   :  { %v946_v43 = vpack.c.bf16 %v922_v40, %v921_v39  ;;  %s1224_s12 = sshll.u32 %s1704_s4, 4  ;;  %s1225_s12 = int_to_ptr.vmem [resolvable:$true] %s1224_s12 }
 0x307   :  { %v945_v44 = vpack.c.bf16 %v920_v42, %v919_v41  ;;  %v1501_v45 = vpop.f32.mrb[48].mxu0  ;;  %s1669_s13 = scalar_lea.vmem %s1225_s12, 4096  ;;  %p1674_p11 = scmp.lt.s32.totalorder %s1225_s12, %s1225_s12 }
 0x308   :  { %v853_v46 = vadd.f32 %v1501_v45, %v1857_v52  ;;  %v844_v47 = vpop.f32.mrb[49].mxu0  ;;  %p1670_p10 = scmp.ne.s32.totalorder %s1225_s12, %s1669_s13  ;;  %p1675_p12 = scmp.lt.s32.totalorder %s1669_s13, %s1669_s13 }
 0x309   :  { %v845_v48 = vadd.f32 %v1857_v52, %v844_v47  ;;  %v1502_v49 = vpop.f32.mrb[50].mxu0  ;;  %1543 = vmatprep.mubr.bf16.mxu1 %v945_v44 }
 0x30a   :  { %v856_v50 = vadd.f32 %v1502_v49, %v1857_v52  ;;  %v847_v51 = vpop.f32.mrb[51].mxu0  ;;  %1544 = vmatmul.mubr.bf16.gmra.mrb[44].mxu1 %v946_v43  ;;  %v925_v54 = vmax.f32 %v853_v46, 0.0  ;;  %p1676_p13 = por %p1675_p12, %p1674_p11 }
 0x30b   :  { %v848_v53 = vadd.f32 %v1857_v52, %v847_v51  ;;  %v923_v55 = vmax.f32 %v845_v48, 0.0 }
 0x30c   :  { %v926_v0 = vmax.f32 %v856_v50, 0.0  ;;  %p1677_p0 = pnand %p1676_p13, %p1670_p10 }
 0x30d   :  { %v924_v56 = vmax.f32 %v848_v53, 0.0 }
 0x30e   :  { %v948_v57 = vpack.c.bf16 %v926_v0, %v925_v54 }
 0x30f   :  { %v947_v58 = vpack.c.bf16 %v924_v56, %v923_v55  ;;  %v1505_v59 = vpop.f32.mrb[52].mxu0 }
 0x310   :  { %v869_v60 = vadd.f32 %v1505_v59, %v1857_v52  ;;  %v860_v7 = vpop.f32.mrb[53].mxu0 }
 0x311   :  { %v861_v61 = vadd.f32 %v1857_v52, %v860_v7  ;;  %v1506_v62 = vpop.f32.mrb[54].mxu0  ;;  %1547 = vmatprep.mubr.bf16.mxu1 %v947_v58 }
 0x312   :  { %v872_v63 = vadd.f32 %v1506_v62, %v1857_v52  ;;  %v863_v1 = vpop.f32.mrb[55].mxu0  ;;  %1548 = vmatmul.mubr.bf16.gmra.mrb[48].mxu1 %v948_v57  ;;  %v929_v3 = vmax.f32 %v869_v60, 0.0 }
 0x313   :  { %v864_v2 = vadd.f32 %v1857_v52, %v863_v1  ;;  %v927_v5 = vmax.f32 %v861_v61, 0.0 }
 0x314   :  { %v930_v4 = vmax.f32 %v872_v63, 0.0 }
 0x315   :  { %v928_v6 = vmax.f32 %v864_v2, 0.0 }
 0x316   :  { %v950_v8 = vpack.c.bf16 %v930_v4, %v929_v3 }
 0x317   :  { %v949_v9 = vpack.c.bf16 %v928_v6, %v927_v5  ;;  %v1509_v10 = vpop.f32.mrb[56].mxu0 }
 0x318   :  { %v885_v11 = vadd.f32 %v1509_v10, %v1857_v52  ;;  %v876_v12 = vpop.f32.mrb[57].mxu0 }
 0x319   :  { %v877_v13 = vadd.f32 %v1857_v52, %v876_v12  ;;  %v1510_v14 = vpop.f32.mrb[58].mxu0  ;;  %1551 = vmatprep.mubr.bf16.mxu1 %v949_v9 }
 0x31a   :  { %v888_v15 = vadd.f32 %v1510_v14, %v1857_v52  ;;  %v879_v16 = vpop.f32.mrb[59].mxu0  ;;  %1552 = vmatmul.mubr.bf16.gmra.mrb[52].mxu1 %v950_v8  ;;  %v933_v18 = vmax.f32 %v885_v11, 0.0 }
 0x31b   :  { %v880_v17 = vadd.f32 %v1857_v52, %v879_v16  ;;  %v931_v20 = vmax.f32 %v877_v13, 0.0 }
 0x31c   :  { %v934_v19 = vmax.f32 %v888_v15, 0.0 }
 0x31d   :  { %v932_v21 = vmax.f32 %v880_v17, 0.0 }
 0x31e   :  { %v952_v22 = vpack.c.bf16 %v934_v19, %v933_v18 }
 0x31f   :  { %v951_v23 = vpack.c.bf16 %v932_v21, %v931_v20  ;;  %v1513_v24 = vpop.f32.mrb[60].mxu0 }
 0x320   :  { %v901_v25 = vadd.f32 %v1513_v24, %v1857_v52  ;;  %v892_v26 = vpop.f32.mrb[61].mxu0 }
 0x321   :  { %v893_v27 = vadd.f32 %v1857_v52, %v892_v26  ;;  %v1514_v28 = vpop.f32.mrb[62].mxu0  ;;  %1555 = vmatprep.mubr.bf16.mxu1 %v951_v23 }
 0x322   :  { %v904_v29 = vadd.f32 %v1514_v28, %v1857_v52  ;;  %v895_v30 = vpop.f32.mrb[63].mxu0  ;;  %1556 = vmatmul.mubr.bf16.gmra.mrb[56].mxu1 %v952_v22  ;;  %v937_v32 = vmax.f32 %v901_v25, 0.0 }
 0x323   :  { %v896_v31 = vadd.f32 %v1857_v52, %v895_v30  ;;  %v935_v34 = vmax.f32 %v893_v27, 0.0 }
 0x324   :  { %v938_v33 = vmax.f32 %v904_v29, 0.0 }
 0x325   :  { %v936_v35 = vmax.f32 %v896_v31, 0.0 }
 0x326   :  { %v954_v36 = vpack.c.bf16 %v938_v33, %v937_v32 }
 0x327   :  { %v953_v37 = vpack.c.bf16 %v936_v35, %v935_v34 }
 0x329   :  { %1559 = vmatprep.mubr.bf16.mxu1 %v953_v37 }
 0x32a   :  { %1560 = vmatmul.mubr.bf16.gmra.mrb[60].mxu1 %v954_v36 }
 0x3c5   :  { %v1533_v39 = vpop.f32.mrb[32].mxu1 }
 0x3c6   :  { %v1069_v40 = vadd.f32 %v1533_v39, %v1894_v38  ;;  %v1060_v41 = vpop.f32.mrb[33].mxu1 }
 0x3c7   :  { %v1061_v42 = vadd.f32 %v1894_v38, %v1060_v41  ;;  %v1534_v52 = vpop.f32.mrb[34].mxu1 }
 0x3c8   :  { %1189 = vst [vmem:[#allocation8 + $0x10] sm:$0xff] %v1069_v40  ;;  %v1072_v43 = vadd.f32 %v1534_v52, %v1894_v38  ;;  %v1063_v44 = vpop.f32.mrb[35].mxu1 }
 0x3c9   :  { %1187 = vst [vmem:[#allocation8] sm:$0xff] %v1061_v42  ;;  %v1064_v45 = vadd.f32 %v1894_v38, %v1063_v44 }
 0x3ca   :  { %1190 = vst [vmem:[#allocation8 + $0x18] sm:$0xff] %v1072_v43 }
 0x3cb   :  { %1188 = vst [vmem:[#allocation8 + $0x8] sm:$0xff] %v1064_v45 }
 0x3cd   :  { %v1537_v46 = vpop.f32.mrb[36].mxu1 }
 0x3ce   :  { %v1085_v47 = vadd.f32 %v1537_v46, %v1894_v38  ;;  %v1076_v48 = vpop.f32.mrb[37].mxu1 }
 0x3cf   :  { %v1077_v49 = vadd.f32 %v1894_v38, %v1076_v48  ;;  %v1538_v50 = vpop.f32.mrb[38].mxu1 }
 0x3d0   :  { %1193 = vst [vmem:[#allocation8 + $0x30] sm:$0xff] %v1085_v47  ;;  %v1088_v51 = vadd.f32 %v1538_v50, %v1894_v38  ;;  %v1079_v53 = vpop.f32.mrb[39].mxu1 }
 0x3d1   :  { %1191 = vst [vmem:[#allocation8 + $0x20] sm:$0xff] %v1077_v49  ;;  %v1080_v54 = vadd.f32 %v1894_v38, %v1079_v53 }
 0x3d2   :  { %1194 = vst [vmem:[#allocation8 + $0x38] sm:$0xff] %v1088_v51 }
 0x3d3   :  { %1192 = vst [vmem:[#allocation8 + $0x28] sm:$0xff] %v1080_v54 }
 0x3d5   :  { %v1541_v0 = vpop.f32.mrb[40].mxu1 }
 0x3d6   :  { %v1101_v55 = vadd.f32 %v1541_v0, %v1894_v38  ;;  %v1092_v56 = vpop.f32.mrb[41].mxu1 }
 0x3d7   :  { %v1093_v57 = vadd.f32 %v1894_v38, %v1092_v56  ;;  %v1542_v58 = vpop.f32.mrb[42].mxu1 }
 0x3d8   :  { %1197 = vst [vmem:[#allocation8 + $0x50] sm:$0xff] %v1101_v55  ;;  %v1104_v59 = vadd.f32 %v1542_v58, %v1894_v38  ;;  %v1095_v60 = vpop.f32.mrb[43].mxu1 }
 0x3d9   :  { %1195 = vst [vmem:[#allocation8 + $0x40] sm:$0xff] %v1093_v57  ;;  %v1096_v7 = vadd.f32 %v1894_v38, %v1095_v60 }
 0x3da   :  { %1198 = vst [vmem:[#allocation8 + $0x58] sm:$0xff] %v1104_v59 }
 0x3db   :  { %1196 = vst [vmem:[#allocation8 + $0x48] sm:$0xff] %v1096_v7 }
 0x3dd   :  { %v1545_v61 = vpop.f32.mrb[44].mxu1 }
 0x3de   :  { %v1117_v62 = vadd.f32 %v1545_v61, %v1894_v38  ;;  %v1108_v63 = vpop.f32.mrb[45].mxu1 }
 0x3df   :  { %v1109_v1 = vadd.f32 %v1894_v38, %v1108_v63  ;;  %v1546_v2 = vpop.f32.mrb[46].mxu1 }
 0x3e0   :  { %1201 = vst [vmem:[#allocation8 + $0x70] sm:$0xff] %v1117_v62  ;;  %v1120_v3 = vadd.f32 %v1546_v2, %v1894_v38  ;;  %v1111_v4 = vpop.f32.mrb[47].mxu1 }
 0x3e1   :  { %1199 = vst [vmem:[#allocation8 + $0x60] sm:$0xff] %v1109_v1  ;;  %v1112_v5 = vadd.f32 %v1894_v38, %v1111_v4 }
 0x3e2   :  { %1202 = vst [vmem:[#allocation8 + $0x78] sm:$0xff] %v1120_v3 }
 0x3e3   :  { %1200 = vst [vmem:[#allocation8 + $0x68] sm:$0xff] %v1112_v5 }
 0x3e5   :  { %v1549_v6 = vpop.f32.mrb[48].mxu1 }
 0x3e6   :  { %v1133_v8 = vadd.f32 %v1549_v6, %v1894_v38  ;;  %v1124_v9 = vpop.f32.mrb[49].mxu1 }
 0x3e7   :  { %v1125_v10 = vadd.f32 %v1894_v38, %v1124_v9  ;;  %v1550_v11 = vpop.f32.mrb[50].mxu1 }
 0x3e8   :  { %1205 = vst [vmem:[#allocation8 + $0x90] sm:$0xff] %v1133_v8  ;;  %v1136_v12 = vadd.f32 %v1550_v11, %v1894_v38  ;;  %v1127_v13 = vpop.f32.mrb[51].mxu1 }
 0x3e9   :  { %1203 = vst [vmem:[#allocation8 + $0x80] sm:$0xff] %v1125_v10  ;;  %v1128_v14 = vadd.f32 %v1894_v38, %v1127_v13 }
 0x3ea   :  { %1206 = vst [vmem:[#allocation8 + $0x98] sm:$0xff] %v1136_v12 }
 0x3eb   :  { %1204 = vst [vmem:[#allocation8 + $0x88] sm:$0xff] %v1128_v14 }
 0x3ed   :  { %v1553_v15 = vpop.f32.mrb[52].mxu1 }
 0x3ee   :  { %v1149_v16 = vadd.f32 %v1553_v15, %v1894_v38  ;;  %v1140_v17 = vpop.f32.mrb[53].mxu1 }
 0x3ef   :  { %v1141_v18 = vadd.f32 %v1894_v38, %v1140_v17  ;;  %v1554_v19 = vpop.f32.mrb[54].mxu1 }
 0x3f0   :  { %1209 = vst [vmem:[#allocation8 + $0xb0] sm:$0xff] %v1149_v16  ;;  %v1152_v20 = vadd.f32 %v1554_v19, %v1894_v38  ;;  %v1143_v21 = vpop.f32.mrb[55].mxu1 }
 0x3f1   :  { %1207 = vst [vmem:[#allocation8 + $0xa0] sm:$0xff] %v1141_v18  ;;  %v1144_v22 = vadd.f32 %v1894_v38, %v1143_v21 }
 0x3f2   :  { %1210 = vst [vmem:[#allocation8 + $0xb8] sm:$0xff] %v1152_v20 }
 0x3f3   :  { %1208 = vst [vmem:[#allocation8 + $0xa8] sm:$0xff] %v1144_v22 }
 0x3f5   :  { %v1557_v23 = vpop.f32.mrb[56].mxu1 }
 0x3f6   :  { %v1165_v24 = vadd.f32 %v1557_v23, %v1894_v38  ;;  %v1156_v25 = vpop.f32.mrb[57].mxu1 }
 0x3f7   :  { %v1157_v26 = vadd.f32 %v1894_v38, %v1156_v25  ;;  %v1558_v27 = vpop.f32.mrb[58].mxu1 }
 0x3f8   :  { %1213 = vst [vmem:[#allocation8 + $0xd0] sm:$0xff] %v1165_v24  ;;  %v1168_v28 = vadd.f32 %v1558_v27, %v1894_v38  ;;  %v1159_v29 = vpop.f32.mrb[59].mxu1 }
 0x3f9   :  { %1211 = vst [vmem:[#allocation8 + $0xc0] sm:$0xff] %v1157_v26  ;;  %v1160_v30 = vadd.f32 %v1894_v38, %v1159_v29 }
 0x3fa   :  { %1214 = vst [vmem:[#allocation8 + $0xd8] sm:$0xff] %v1168_v28 }
 0x3fb   :  { %1212 = vst [vmem:[#allocation8 + $0xc8] sm:$0xff] %v1160_v30 }
 0x3fd   :  { %v1561_v31 = vpop.f32.mrb[60].mxu1 }
 0x3fe   :  { %v1181_v32 = vadd.f32 %v1561_v31, %v1894_v38  ;;  %v1172_v33 = vpop.f32.mrb[61].mxu1 }
 0x3ff   :  { %v1173_v34 = vadd.f32 %v1894_v38, %v1172_v33  ;;  %v1562_v35 = vpop.f32.mrb[62].mxu1 }
 0x400   :  { %1217 = vst [vmem:[#allocation8 + $0xf0] sm:$0xff] %v1181_v32  ;;  %v1184_v36 = vadd.f32 %v1562_v35, %v1894_v38  ;;  %v1175_v37 = vpop.f32.mrb[63].mxu1 }
 0x401   :  { %1215 = vst [vmem:[#allocation8 + $0xe0] sm:$0xff] %v1173_v34  ;;  %v1176_v39 = vadd.f32 %v1894_v38, %v1175_v37 }
 0x402   :  { %1218 = vst [vmem:[#allocation8 + $0xf8] sm:$0xff] %v1184_v36 }
 0x403   :  { %1216 = vst [vmem:[#allocation8 + $0xe8] sm:$0xff] %v1176_v39 }
 0x404   :  { %1680 = shalt.err (!%p1677_p0)
}
 0x405   :  { %s1681_s16 = scalar_lea.hbm %s1948_s5, 4096 }
 0x406   :  { %p1682_p1 = scmp.ne.s32.totalorder %s1948_s5, %s1681_s16  ;;  %p1685_p2 = scmp.lt.u32.totalorder %s1681_s16, %s1948_s5 }
 0x408   :  { %p1687_p3 = pnand %p1685_p2, %p1682_p1 }
 0x40a   :  { %1690 = shalt.err (!%p1687_p3)
}
 0x40b   :  { %1230 = dma.vmem_to_hbm [thread:$0]  %s1225_s12, 4096, %s1948_s5, [#allocation4], %s1701_s1, %s1701_s1, %s1702_s17  }
 0x40c   :  { %1695 = dma.done.wait [#allocation4], 4096  }
 0x40d   :  { %1696 = vsyncadd [#allocation4], 4294963200 }
 0x40e   :  { %1234 = vsyncpa [#allocation3], 1 }
 0x40f   :  { %1235 = vsyncpa [#allocation6], 1 }
 0x410   :  { %1236 = vsyncpa [#allocation4], 1 }

</bundles_post_ra>
